<compile_context>
chip_gen: v7x
topology: tpu7x:2x2x1
jax: 0.10.0
libtpu: 0.0.40
codegen_flags: <defaults>
</compile_context>

<pallas_src>
import functools
import math
from typing import NamedTuple, Optional

import jax
import jax.numpy as jnp
from jax import lax
from jax.experimental import pallas as pl
from jax.experimental.pallas import tpu as pltpu

_LANE = 128


def _round_up(x, m):
    return (x + m - 1) // m * m


def _gelu(h_f32, *, approx, dtype):
    """GELU on the f32 accumulator.

    approx=False: exact-erf GELU in f32 (matches torch.nn.GELU() default).
    approx=True : tanh-approx GELU evaluated in `dtype` (bf16 fast path) --
                  tanh goes to the EUP slot and bf16 halves VALU/vreg traffic.
    """
    if approx:
        x = h_f32.astype(dtype)
        c = jnp.asarray(0.7978845608028654, dtype)     # sqrt(2/pi)
        a = jnp.asarray(0.044715, dtype)
        half = jnp.asarray(0.5, dtype)
        one = jnp.asarray(1.0, dtype)
        return half * x * (one + jnp.tanh(c * (x + a * (x * x * x))))
    return 0.5 * h_f32 * (1.0 + lax.erf(h_f32 * 0.7071067811865476))


# ----------------------------------------------------------------------------
# Kernels
# ----------------------------------------------------------------------------

def _mlp_kernel(x_ref, w1_ref, b1_ref, w2_ref, b2_ref, o_ref, *, approx):
    """Single-pass kernel: both weight matrices fully resident in VMEM."""
    compute_dtype = w2_ref.dtype

    # fc1 + GELU (dropout p=0.0 elided)
    h = jnp.dot(x_ref[...], w1_ref[...], preferred_element_type=jnp.float32)
    h = h + b1_ref[...].astype(jnp.float32)
    h = _gelu(h, approx=approx, dtype=compute_dtype)
    h = h.astype(compute_dtype)

    # fc2 + GELU (dropout p=0.0 elided)
    y = jnp.dot(h, w2_ref[...], preferred_element_type=jnp.float32)
    y = y + b2_ref[...].astype(jnp.float32)
    y = _gelu(y, approx=approx, dtype=o_ref.dtype)
    o_ref[...] = y.astype(o_ref.dtype)


def _mlp_kernel_cout_tiled(x_ref, w1_ref, b1_ref, w2_ref, b2_ref, o_ref,
                           h_ref, *, approx):
    """Cout-tiled kernel: W2 streamed in (H, tn) tiles; fc1+GELU intermediate
    cached in VMEM scratch and computed only at the first Cout tile."""
    @pl.when(pl.program_id(1) == 0)
    def _():
        h = jnp.dot(x_ref[...], w1_ref[...], preferred_element_type=jnp.float32)
        h = h + b1_ref[...].astype(jnp.float32)
        h = _gelu(h, approx=approx, dtype=h_ref.dtype)
        h_ref[...] = h.astype(h_ref.dtype)

    y = jnp.dot(h_ref[...], w2_ref[...], preferred_element_type=jnp.float32)
    y = y + b2_ref[...].astype(jnp.float32)
    y = _gelu(y, approx=approx, dtype=o_ref.dtype)
    o_ref[...] = y.astype(o_ref.dtype)


# ----------------------------------------------------------------------------
# pallas_call wrapper
# ----------------------------------------------------------------------------

def mlp_pallas(x2d, w1, b1_2d, w2, b2_2d, *, tm, tn=None, approx):
    """x2d: (M, Cin_p); w1: (Cin_p, H_p); b1: (1, H_p); w2: (H_p, Cout_p);
    b2: (1, Cout_p). All dims pre-padded: M % tm == 0, features % 128 == 0."""
    M, cin_p = x2d.shape
    h_p = w1.shape[1]
    cout_p = w2.shape[1]
    compute_dtype = x2d.dtype
    itemsize = jnp.dtype(compute_dtype).itemsize

    assert M % tm == 0
    assert cin_p % _LANE == 0 and h_p % _LANE == 0 and cout_p % _LANE == 0

    try:
        vmem_cap = int(pltpu.get_tpu_info().vmem_capacity_bytes)
    except Exception:  # fall back to the most conservative per-TC capacity
        vmem_cap = 64 << 20

    # Auto-enable Cout tiling when even single-buffered weights would not fit
    # comfortably (e.g. f32 ViT-L/H on v7x's 64 MiB per TensorCore).
    if tn is None:
        resident = (w1.size * w1.dtype.itemsize + w2.size * w2.dtype.itemsize
                    + 2 * tm * (cin_p + cout_p) * itemsize
                    + tm * h_p * (4 + itemsize))
        if resident > vmem_cap - (16 << 20):
            for cand in (512, 256, 128):
                if cout_p % cand == 0:
                    tn = cand
                    break
    if tn is not None and tn >= cout_p:
        tn = None
    if tn is not None:
        assert tn % _LANE == 0 and cout_p % tn == 0

    def run(use_buffered):
        # Constant-index (fully resident) specs: single-buffered when allowed.
        resident_kw = {"pipeline_mode": pl.Buffered(1)} if use_buffered else {}
        tn_eff = cout_p if tn is None else tn
        w_buf = 1 if use_buffered else 2
        w2_buf = 2 if tn is not None else w_buf

        bytes_needed = (
            w_buf * w1.size * w1.dtype.itemsize
            + w2_buf * h_p * tn_eff * w2.dtype.itemsize
            + 2 * tm * cin_p * itemsize            # x tiles (double-buffered)
            + 2 * tm * tn_eff * itemsize           # out tiles
            + 4 * (h_p + tn_eff) * b1_2d.dtype.itemsize
            + tm * h_p * (4 + itemsize)            # f32 acc + intermediate/scratch
            + tm * tn_eff * 4                      # f32 fc2 accumulator
        )
        # >= 8 MiB headroom below capacity for Mosaic internal scratch.
        vmem_limit = max(32 << 20, int(bytes_needed * 3 // 2) + (4 << 20))
        vmem_limit = min(vmem_limit, vmem_cap - (8 << 20))

        if tn is None:
            kernel = functools.partial(_mlp_kernel, approx=approx)
            grid_spec = pltpu.PrefetchScalarGridSpec(
                num_scalar_prefetch=0,
                grid=(M // tm,),
                in_specs=[
                    pl.BlockSpec((tm, cin_p), lambda i: (i, 0)),
                    pl.BlockSpec((cin_p, h_p), lambda i: (0, 0), **resident_kw),
                    pl.BlockSpec((1, h_p), lambda i: (0, 0), **resident_kw),
                    pl.BlockSpec((h_p, cout_p), lambda i: (0, 0), **resident_kw),
                    pl.BlockSpec((1, cout_p), lambda i: (0, 0), **resident_kw),
                ],
                out_specs=pl.BlockSpec((tm, cout_p), lambda i: (i, 0)),
            )
            dims = ("parallel",)
        else:
            kernel = functools.partial(_mlp_kernel_cout_tiled, approx=approx)
            grid_spec = pltpu.PrefetchScalarGridSpec(
                num_scalar_prefetch=0,
                grid=(M // tm, cout_p // tn),
                in_specs=[
                    pl.BlockSpec((tm, cin_p), lambda i, j: (i, 0)),
                    pl.BlockSpec((cin_p, h_p), lambda i, j: (0, 0), **resident_kw),
                    pl.BlockSpec((1, h_p), lambda i, j: (0, 0), **resident_kw),
                    pl.BlockSpec((h_p, tn), lambda i, j: (0, j)),
                    pl.BlockSpec((1, tn), lambda i, j: (0, j)),
                ],
                out_specs=pl.BlockSpec((tm, tn), lambda i, j: (i, j)),
                scratch_shapes=[pltpu.VMEM((tm, h_p), compute_dtype)],
            )
            dims = ("parallel", "arbitrary")

        return pl.pallas_call(
            kernel,
            out_shape=jax.ShapeDtypeStruct((M, cout_p), compute_dtype),
            grid_spec=grid_spec,
            compiler_params=pltpu.CompilerParams(
                dimension_semantics=dims,
                vmem_limit_bytes=int(vmem_limit),
            ),
        )(x2d, w1, b1_2d, w2, b2_2d)

    try:
        return run(True)
    except Exception:
        # pipeline_mode=pl.Buffered(1) unsupported on this jax build:
        # fall back to default double-buffering of the resident weights.
        return run(False)


# ----------------------------------------------------------------------------
# Parameter preparation (pad once at init -- no per-forward HBM repack)
# ----------------------------------------------------------------------------

class MLPParams(NamedTuple):
    w1: jax.Array   # (Cin_p, H_p)  == fc1.weight.T, zero-padded
    b1: jax.Array   # (1, H_p)
    w2: jax.Array   # (H_p, Cout_p) == fc2.weight.T, zero-padded
    b2: jax.Array   # (1, Cout_p)
    cin: int
    cout: int


def prepare_mlp_params(w1, b1, w2, b2, *, lane_multiple=_LANE):
    """w1: (Cin, H); b1: (H,); w2: (H, Cout); b2: (Cout,) -- already transposed
    relative to PyTorch's nn.Linear.weight. Zero padding is an exact no-op for
    this computation (padded rows/cols contribute nothing and are sliced off)."""
    cin, hid = w1.shape
    cout = w2.shape[1]
    cin_p = _round_up(cin, lane_multiple)
    h_p = _round_up(hid, lane_multiple)
    cout_p = _round_up(cout, lane_multiple)
    w1 = jnp.pad(w1, ((0, cin_p - cin), (0, h_p - hid)))
    b1 = jnp.pad(b1, (0, h_p - hid)).reshape(1, h_p)
    w2 = jnp.pad(w2, ((0, h_p - hid), (0, cout_p - cout)))
    b2 = jnp.pad(b2, (0, cout_p - cout)).reshape(1, cout_p)
    return MLPParams(w1, b1, w2, b2, cin, cout)


def mlp_forward(x, params: MLPParams, *, tm=256, tn: Optional[int] = None,
                approximate_gelu: Optional[bool] = None):
    """x: (..., Cin) -> (..., Cout). Plain-JAX glue: flatten, pad rows, call kernel."""
    *lead, cin = x.shape
    assert cin == params.cin, "input feature dim must match prepared params"
    M = int(math.prod(lead)) if lead else 1
    x2d = x.reshape(M, cin)

    cin_p = params.w1.shape[0]
    if cin_p != cin:
        x2d = jnp.pad(x2d, ((0, 0), (0, cin_p - cin)))

    itemsize = jnp.dtype(x2d.dtype).itemsize
    sublane = 16 if itemsize == 2 else 8          # bf16 min sublane tile = 16
    tm_eff = max(sublane, min(_round_up(tm, sublane), _round_up(M, sublane)))
    M_p = _round_up(M, tm_eff)
    n_tiles = M_p // tm_eff
    if n_tiles > 1 and n_tiles % 2 == 1:
        M_p += tm_eff                              # even split across v7x's 2 TCs
    if M_p != M:
        x2d = jnp.pad(x2d, ((0, M_p - M), (0, 0)))

    # bf16/fp16 fast path uses the tanh-approx GELU; f32 keeps exact erf.
    approx = (itemsize < 4) if approximate_gelu is None else bool(approximate_gelu)

    y2d = mlp_pallas(x2d, params.w1, params.b1, params.w2, params.b2,
                     tm=tm_eff, tn=tn, approx=approx)
    y2d = y2d[:M, :params.cout]
    return y2d.reshape(*lead, params.cout)


def mlp_reference(x, w1, b1, w2, b2):
    """Exact-erf f32 reference matching the PyTorch module."""
    h = _gelu(jnp.dot(x, w1) + b1, approx=False, dtype=jnp.float32)
    y = _gelu(jnp.dot(h, w2) + b2, approx=False, dtype=jnp.float32)
    return y


# TODO(synk): nn.Dropout with p > 0 would need pltpu.prng_seed/prng_random_bits;
#             the module uses p=0.0 so dropout is the identity and is elided.

if __name__ == "__main__":
    key = jax.random.PRNGKey(0)
    kx, k1, kb1, k2, kb2, kx3, k13, kb13, k23, kb23 = jax.random.split(key, 10)

    # ---- Test 1: f32 exact path (small ViT-ish shapes) ----
    B, N, Cin, H, Cout = 2, 8, 32, 64, 32
    x = jax.random.normal(kx, (B, N, Cin), dtype=jnp.float32)
    bound1 = 1.0 / math.sqrt(Cin)
    w1 = jax.random.uniform(k1, (Cin, H), jnp.float32, -bound1, bound1)
    b1 = jax.random.uniform(kb1, (H,), jnp.float32, -bound1, bound1)
    bound2 = 1.0 / math.sqrt(H)
    w2 = jax.random.uniform(k2, (H, Cout), jnp.float32, -bound2, bound2)
    b2 = jax.random.uniform(kb2, (Cout,), jnp.float32, -bound2, bound2)

    params_f32 = prepare_mlp_params(w1, b1, w2, b2)
    out_f32 = jax.block_until_ready(mlp_forward(x, params_f32))
    ref_f32 = mlp_reference(x, w1, b1, w2, b2)
    assert out_f32.shape == (B, N, Cout)
    assert jnp.allclose(out_f32, ref_f32, atol=1e-5, rtol=1e-5)

    # ---- Test 2: bf16 fast path (tanh-approx GELU, f32 MXU accumulation) ----
    params_bf16 = prepare_mlp_params(
        w1.astype(jnp.bfloat16), b1.astype(jnp.bfloat16),
        w2.astype(jnp.bfloat16), b2.astype(jnp.bfloat16))
    out_bf16 = jax.block_until_ready(mlp_forward(x.astype(jnp.bfloat16), params_bf16))
    assert out_bf16.dtype == jnp.bfloat16
    assert jnp.allclose(out_bf16.astype(jnp.float32), ref_f32, atol=5e-2, rtol=5e-2)

    # ---- Test 3: Cout-tiled kernel (forced tn) -- exercises pl.when + scratch ----
    B3, N3, Cin3, H3, Cout3 = 2, 128, 128, 256, 256
    x3 = jax.random.normal(kx3, (B3, N3, Cin3), dtype=jnp.float32)
    bnd13 = 1.0 / math.sqrt(Cin3)
    w13 = jax.random.uniform(k13, (Cin3, H3), jnp.float32, -bnd13, bnd13)
    b13 = jax.random.uniform(kb13, (H3,), jnp.float32, -bnd13, bnd13)
    bnd23 = 1.0 / math.sqrt(H3)
    w23 = jax.random.uniform(k23, (H3, Cout3), jnp.float32, -bnd23, bnd23)
    b23 = jax.random.uniform(kb23, (Cout3,), jnp.float32, -bnd23, bnd23)

    params3 = prepare_mlp_params(
        w13.astype(jnp.bfloat16), b13.astype(jnp.bfloat16),
        w23.astype(jnp.bfloat16), b23.astype(jnp.bfloat16))
    out3 = jax.block_until_ready(
        mlp_forward(x3.astype(jnp.bfloat16), params3, tm=128, tn=128))
    ref3 = mlp_reference(
        x3.astype(jnp.bfloat16).astype(jnp.float32),
        w13.astype(jnp.bfloat16).astype(jnp.float32),
        b13.astype(jnp.bfloat16).astype(jnp.float32),
        w23.astype(jnp.bfloat16).astype(jnp.float32),
        b23.astype(jnp.bfloat16).astype(jnp.float32))
    assert out3.shape == (B3, N3, Cout3)
    assert jnp.allclose(out3.astype(jnp.float32), ref3, atol=5e-2, rtol=5e-2)

    print("KERNEL_OK")
</pallas_src>

<mosaic_0001>
module attributes {stable_mosaic.version = 11 : i64} {
  func.func @_mlp_kernel(%arg0: i32, %arg1: memref<16x128xf32, #tpu.memory_space<vmem>>, %arg2: memref<128x128xf32, #tpu.memory_space<vmem>>, %arg3: memref<1x128xf32, #tpu.memory_space<vmem>>, %arg4: memref<128x128xf32, #tpu.memory_space<vmem>>, %arg5: memref<1x128xf32, #tpu.memory_space<vmem>>, %arg6: memref<16x128xf32, #tpu.memory_space<vmem>>) attributes {dimension_semantics = [#tpu.dimension_semantics<parallel>], iteration_bounds = array<i64: 1>, scalar_prefetch = 0 : i64, scratch_operands = 0 : i64, tpu.core_type = #tpu.core_type<tc>, window_params = [{transform_indices = @transform_0, window_bounds = array<i64: 16, 128>}, {pipeline_mode = #tpu.pipeline_mode<synchronous>, transform_indices = @transform_1, window_bounds = array<i64: 128, 128>}, {pipeline_mode = #tpu.pipeline_mode<synchronous>, transform_indices = @transform_2, window_bounds = array<i64: 1, 128>}, {pipeline_mode = #tpu.pipeline_mode<synchronous>, transform_indices = @transform_3, window_bounds = array<i64: 128, 128>}, {pipeline_mode = #tpu.pipeline_mode<synchronous>, transform_indices = @transform_4, window_bounds = array<i64: 1, 128>}, {transform_indices = @transform_5, window_bounds = array<i64: 16, 128>}]} {
    %c0 = arith.constant 0 : index
    %c0_0 = arith.constant 0 : index
    %0 = vector.load %arg1[%c0, %c0_0] : memref<16x128xf32, #tpu.memory_space<vmem>>, vector<16x128xf32>
    %c0_1 = arith.constant 0 : index
    %c0_2 = arith.constant 0 : index
    %1 = vector.load %arg2[%c0_1, %c0_2] : memref<128x128xf32, #tpu.memory_space<vmem>>, vector<128x128xf32>
    %cst = arith.constant dense<0.000000e+00> : vector<16x128xf32>
    %2 = tpu.matmul %0, %1, %cst {dimension_numbers = #tpu.dot_dimension_numbers<[1], [0], [0], [1], [0, 0, 1, 1], [], []>} : vector<16x128xf32>, vector<128x128xf32>, vector<16x128xf32> -> vector<16x128xf32>
    %c0_3 = arith.constant 0 : index
    %c0_4 = arith.constant 0 : index
    %3 = vector.load %arg3[%c0_3, %c0_4] : memref<1x128xf32, #tpu.memory_space<vmem>>, vector<1x128xf32>
    %4 = vector.broadcast %3 : vector<1x128xf32> to vector<16x128xf32>
    %5 = arith.addf %2, %4 : vector<16x128xf32>
    %cst_5 = arith.constant 5.000000e-01 : f32
    %6 = vector.broadcast %cst_5 : f32 to vector<16x128xf32>
    %7 = arith.mulf %6, %5 : vector<16x128xf32>
    %cst_6 = arith.constant 0.707106769 : f32
    %8 = vector.broadcast %cst_6 : f32 to vector<16x128xf32>
    %9 = arith.mulf %5, %8 : vector<16x128xf32>
    %10 = math.erf %9 : vector<16x128xf32>
    %cst_7 = arith.constant 1.000000e+00 : f32
    %11 = vector.broadcast %cst_7 : f32 to vector<16x128xf32>
    %12 = arith.addf %11, %10 : vector<16x128xf32>
    %13 = arith.mulf %7, %12 : vector<16x128xf32>
    %c0_8 = arith.constant 0 : index
    %c0_9 = arith.constant 0 : index
    %14 = vector.load %arg4[%c0_8, %c0_9] : memref<128x128xf32, #tpu.memory_space<vmem>>, vector<128x128xf32>
    %cst_10 = arith.constant dense<0.000000e+00> : vector<16x128xf32>
    %15 = tpu.matmul %13, %14, %cst_10 {dimension_numbers = #tpu.dot_dimension_numbers<[1], [0], [0], [1], [0, 0, 1, 1], [], []>} : vector<16x128xf32>, vector<128x128xf32>, vector<16x128xf32> -> vector<16x128xf32>
    %c0_11 = arith.constant 0 : index
    %c0_12 = arith.constant 0 : index
    %16 = vector.load %arg5[%c0_11, %c0_12] : memref<1x128xf32, #tpu.memory_space<vmem>>, vector<1x128xf32>
    %17 = vector.broadcast %16 : vector<1x128xf32> to vector<16x128xf32>
    %18 = arith.addf %15, %17 : vector<16x128xf32>
    %cst_13 = arith.constant 5.000000e-01 : f32
    %19 = vector.broadcast %cst_13 : f32 to vector<16x128xf32>
    %20 = arith.mulf %19, %18 : vector<16x128xf32>
    %cst_14 = arith.constant 0.707106769 : f32
    %21 = vector.broadcast %cst_14 : f32 to vector<16x128xf32>
    %22 = arith.mulf %18, %21 : vector<16x128xf32>
    %23 = math.erf %22 : vector<16x128xf32>
    %cst_15 = arith.constant 1.000000e+00 : f32
    %24 = vector.broadcast %cst_15 : f32 to vector<16x128xf32>
    %25 = arith.addf %24, %23 : vector<16x128xf32>
    %26 = arith.mulf %20, %25 : vector<16x128xf32>
    %c0_16 = arith.constant 0 : index
    %c0_17 = arith.constant 0 : index
    %27 = vector.load %arg6[%c0_16, %c0_17] : memref<16x128xf32, #tpu.memory_space<vmem>>, vector<16x128xf32>
    tpu.vector_store %arg6[%c0_16, %c0_17], %26 {strides = array<i32>} : memref<16x128xf32, #tpu.memory_space<vmem>>, vector<16x128xf32>,
    return
  }
  func.func @transform_0(%arg0: i32) -> (i32, i32) {
    %c0_i32 = arith.constant 0 : i32
    %c0_i32_0 = arith.constant 0 : i32
    return %arg0, %c0_i32 : i32, i32
  }
  func.func @transform_1(%arg0: i32) -> (i32, i32) {
    %c0_i32 = arith.constant 0 : i32
    %c0_i32_0 = arith.constant 0 : i32
    %c0_i32_1 = arith.constant 0 : i32
    return %c0_i32, %c0_i32_0 : i32, i32
  }
  func.func @transform_2(%arg0: i32) -> (i32, i32) {
    %c0_i32 = arith.constant 0 : i32
    %c0_i32_0 = arith.constant 0 : i32
    %c0_i32_1 = arith.constant 0 : i32
    return %c0_i32, %c0_i32_0 : i32, i32
  }
  func.func @transform_3(%arg0: i32) -> (i32, i32) {
    %c0_i32 = arith.constant 0 : i32
    %c0_i32_0 = arith.constant 0 : i32
    %c0_i32_1 = arith.constant 0 : i32
    return %c0_i32, %c0_i32_0 : i32, i32
  }
  func.func @transform_4(%arg0: i32) -> (i32, i32) {
    %c0_i32 = arith.constant 0 : i32
    %c0_i32_0 = arith.constant 0 : i32
    %c0_i32_1 = arith.constant 0 : i32
    return %c0_i32, %c0_i32_0 : i32, i32
  }
  func.func @transform_5(%arg0: i32) -> (i32, i32) {
    %c0_i32 = arith.constant 0 : i32
    %c0_i32_0 = arith.constant 0 : i32
    return %arg0, %c0_i32 : i32, i32
  }
}

module attributes {stable_mosaic.version = 11 : i64} {
  func.func @_mlp_kernel(%arg0: i32, %arg1: memref<16x128xf32, #tpu.memory_space<vmem>>, %arg2: memref<128x128xf32, #tpu.memory_space<vmem>>, %arg3: memref<1x128xf32, #tpu.memory_space<vmem>>, %arg4: memref<128x128xf32, #tpu.memory_space<vmem>>, %arg5: memref<1x128xf32, #tpu.memory_space<vmem>>, %arg6: memref<16x128xf32, #tpu.memory_space<vmem>>) attributes {dimension_semantics = [#tpu.dimension_semantics<parallel>], iteration_bounds = array<i64: 1>, scalar_prefetch = 0 : i64, scratch_operands = 0 : i64, tpu.core_type = #tpu.core_type<tc>, window_params = [{transform_indices = @transform_0, window_bounds = array<i64: 16, 128>}, {pipeline_mode = #tpu.pipeline_mode<synchronous>, transform_indices = @transform_1, window_bounds = array<i64: 128, 128>}, {pipeline_mode = #tpu.pipeline_mode<synchronous>, transform_indices = @transform_2, window_bounds = array<i64: 1, 128>}, {pipeline_mode = #tpu.pipeline_mode<synchronous>, transform_indices = @transform_3, window_bounds = array<i64: 128, 128>}, {pipeline_mode = #tpu.pipeline_mode<synchronous>, transform_indices = @transform_4, window_bounds = array<i64: 1, 128>}, {transform_indices = @transform_5, window_bounds = array<i64: 16, 128>}]} {
    %c0 = arith.constant 0 : index
    %c0_0 = arith.constant 0 : index
    %0 = vector.load %arg1[%c0, %c0_0] : memref<16x128xf32, #tpu.memory_space<vmem>>, vector<16x128xf32>
    %c0_1 = arith.constant 0 : index
    %c0_2 = arith.constant 0 : index
    %1 = vector.load %arg2[%c0_1, %c0_2] : memref<128x128xf32, #tpu.memory_space<vmem>>, vector<128x128xf32>
    %cst = arith.constant dense<0.000000e+00> : vector<16x128xf32>
    %2 = tpu.matmul %0, %1, %cst {dimension_numbers = #tpu.dot_dimension_numbers<[1], [0], [0], [1], [0, 0, 1, 1], [], []>} : vector<16x128xf32>, vector<128x128xf32>, vector<16x128xf32> -> vector<16x128xf32>
    %c0_3 = arith.constant 0 : index
    %c0_4 = arith.constant 0 : index
    %3 = vector.load %arg3[%c0_3, %c0_4] : memref<1x128xf32, #tpu.memory_space<vmem>>, vector<1x128xf32>
    %4 = vector.broadcast %3 : vector<1x128xf32> to vector<16x128xf32>
    %5 = arith.addf %2, %4 : vector<16x128xf32>
    %cst_5 = arith.constant 5.000000e-01 : f32
    %6 = vector.broadcast %cst_5 : f32 to vector<16x128xf32>
    %7 = arith.mulf %6, %5 : vector<16x128xf32>
    %cst_6 = arith.constant 0.707106769 : f32
    %8 = vector.broadcast %cst_6 : f32 to vector<16x128xf32>
    %9 = arith.mulf %5, %8 : vector<16x128xf32>
    %10 = math.erf %9 : vector<16x128xf32>
    %cst_7 = arith.constant 1.000000e+00 : f32
    %11 = vector.broadcast %cst_7 : f32 to vector<16x128xf32>
    %12 = arith.addf %11, %10 : vector<16x128xf32>
    %13 = arith.mulf %7, %12 : vector<16x128xf32>
    %c0_8 = arith.constant 0 : index
    %c0_9 = arith.constant 0 : index
    %14 = vector.load %arg4[%c0_8, %c0_9] : memref<128x128xf32, #tpu.memory_space<vmem>>, vector<128x128xf32>
    %cst_10 = arith.constant dense<0.000000e+00> : vector<16x128xf32>
    %15 = tpu.matmul %13, %14, %cst_10 {dimension_numbers = #tpu.dot_dimension_numbers<[1], [0], [0], [1], [0, 0, 1, 1], [], []>} : vector<16x128xf32>, vector<128x128xf32>, vector<16x128xf32> -> vector<16x128xf32>
    %c0_11 = arith.constant 0 : index
    %c0_12 = arith.constant 0 : index
    %16 = vector.load %arg5[%c0_11, %c0_12] : memref<1x128xf32, #tpu.memory_space<vmem>>, vector<1x128xf32>
    %17 = vector.broadcast %16 : vector<1x128xf32> to vector<16x128xf32>
    %18 = arith.addf %15, %17 : vector<16x128xf32>
    %cst_13 = arith.constant 5.000000e-01 : f32
    %19 = vector.broadcast %cst_13 : f32 to vector<16x128xf32>
    %20 = arith.mulf %19, %18 : vector<16x128xf32>
    %cst_14 = arith.constant 0.707106769 : f32
    %21 = vector.broadcast %cst_14 : f32 to vector<16x128xf32>
    %22 = arith.mulf %18, %21 : vector<16x128xf32>
    %23 = math.erf %22 : vector<16x128xf32>
    %cst_15 = arith.constant 1.000000e+00 : f32
    %24 = vector.broadcast %cst_15 : f32 to vector<16x128xf32>
    %25 = arith.addf %24, %23 : vector<16x128xf32>
    %26 = arith.mulf %20, %25 : vector<16x128xf32>
    %c0_16 = arith.constant 0 : index
    %c0_17 = arith.constant 0 : index
    %27 = vector.load %arg6[%c0_16, %c0_17] : memref<16x128xf32, #tpu.memory_space<vmem>>, vector<16x128xf32>
    tpu.vector_store %arg6[%c0_16, %c0_17], %26 {strides = array<i32>} : memref<16x128xf32, #tpu.memory_space<vmem>>, vector<16x128xf32>,
    return
  }
  func.func @transform_0(%arg0: i32) -> (i32, i32) {
    %c0_i32 = arith.constant 0 : i32
    %c0_i32_0 = arith.constant 0 : i32
    return %arg0, %c0_i32 : i32, i32
  }
  func.func @transform_1(%arg0: i32) -> (i32, i32) {
    %c0_i32 = arith.constant 0 : i32
    %c0_i32_0 = arith.constant 0 : i32
    %c0_i32_1 = arith.constant 0 : i32
    return %c0_i32, %c0_i32_0 : i32, i32
  }
  func.func @transform_2(%arg0: i32) -> (i32, i32) {
    %c0_i32 = arith.constant 0 : i32
    %c0_i32_0 = arith.constant 0 : i32
    %c0_i32_1 = arith.constant 0 : i32
    return %c0_i32, %c0_i32_0 : i32, i32
  }
  func.func @transform_3(%arg0: i32) -> (i32, i32) {
    %c0_i32 = arith.constant 0 : i32
    %c0_i32_0 = arith.constant 0 : i32
    %c0_i32_1 = arith.constant 0 : i32
    return %c0_i32, %c0_i32_0 : i32, i32
  }
  func.func @transform_4(%arg0: i32) -> (i32, i32) {
    %c0_i32 = arith.constant 0 : i32
    %c0_i32_0 = arith.constant 0 : i32
    %c0_i32_1 = arith.constant 0 : i32
    return %c0_i32, %c0_i32_0 : i32, i32
  }
  func.func @transform_5(%arg0: i32) -> (i32, i32) {
    %c0_i32 = arith.constant 0 : i32
    %c0_i32_0 = arith.constant 0 : i32
    return %arg0, %c0_i32 : i32, i32
  }
}

</mosaic_0001>

<bundles_post_ra>
// kernel: tpu_custom_call.1
= control target key start
LH: loop header
LB: loop body
LE: loop exit
PB: predicated region body
PF: predicated region fallthrough
CT: control target
= control target key end

     0   :  { %10 = vsyncpa [#allocation3], 0  ;;  %s689_s0 = inlined_call_operand.hbm [shape: f32[16,128], index: 0, kind: input, shape index: {}]   ;;  %s690_s1 = inlined_call_operand.hbm [shape: f32[128,128], index: 1, kind: input, shape index: {}]   ;;  %s691_s2 = inlined_call_operand.vmem [shape: f32[1,128], index: 2, kind: input, shape index: {}]   ;;  %s692_s3 = inlined_call_operand.hbm [shape: f32[128,128], index: 3, kind: input, shape index: {}]   ;;  %s693_s4 = inlined_call_operand.vmem [shape: f32[1,128], index: 4, kind: input, shape index: {}]   ;;  %s694_s5 = inlined_call_operand.hbm [shape: f32[16,128], index: 5, kind: output, shape index: {}]  }
   0x1   :  { %11 = vsyncpa [#allocation6], 0 }
   0x2   :  { %12 = vsyncpa [#allocation4], 0  ;;  %s580_s18 = smov [#allocation5]   ;;  %s581_s20 = smov [#allocation2]  }
   0x3   :  { %s30_s19 = sshll.u32 %s580_s18, 4  ;;  %s18_s21 = sshll.u32 %s581_s20, 4  ;;  %s31_s19 = int_to_ptr.vmem [resolvable:$true] %s30_s19  ;;  %s616_s21 = int_to_ptr.vmem [resolvable:$true] %s18_s21 }
   0x4   :  { %s486_s24 = scalar_lea.hbm %s690_s1, 2048 }
   0x5   :  { %p487_p0 = scmp.ne.s32.totalorder %s690_s1, %s486_s24  ;;  %p490_p1 = scmp.lt.u32.totalorder %s486_s24, %s690_s1 }
   0x7   :  { %p492_p2 = pnand %p490_p1, %p487_p0 }
   0x9   :  { %495 = shalt.err (!%p492_p2)
}
   0xa   :  { %s496_s29 = scalar_lea.vmem %s31_s19, 2048  ;;  %p501_p4 = scmp.lt.s32.totalorder %s31_s19, %s31_s19 }
   0xb   :  { %p497_p3 = scmp.ne.s32.totalorder %s31_s19, %s496_s29  ;;  %p502_p5 = scmp.lt.s32.totalorder %s496_s29, %s496_s29 }
   0xd   :  { %p503_p6 = por %p502_p5, %p501_p4 }
   0xf   :  { %p504_p7 = pnand %p503_p6, %p497_p3 }
  0x11   :  { %507 = shalt.err (!%p504_p7)
}
  0x12   :  { %s582_s30 = smov 128   ;;  %s583_s6 = smov 8  }
  0x13   :  { %36 = dma.hbm_to_vmem [thread:$0]  %s690_s1, 2048, %s31_s19, [#allocation6], %s582_s30, %s582_s30, %s583_s6  }
  0x14   :  { %s508_s11 = scalar_lea.hbm %s689_s0, 256 }
  0x15   :  { %p509_p8 = scmp.ne.s32.totalorder %s689_s0, %s508_s11  ;;  %p512_p9 = scmp.lt.u32.totalorder %s508_s11, %s689_s0 }
  0x17   :  { %p514_p10 = pnand %p512_p9, %p509_p8 }
  0x19   :  { %517 = shalt.err (!%p514_p10)
}
  0x1a   :  { %s518_s16 = scalar_lea.vmem %s616_s21, 256  ;;  %p523_p12 = scmp.lt.s32.totalorder %s616_s21, %s616_s21 }
  0x1b   :  { %p519_p11 = scmp.ne.s32.totalorder %s616_s21, %s518_s16  ;;  %p524_p13 = scmp.lt.s32.totalorder %s518_s16, %s518_s16 }
  0x1d   :  { %p525_p0 = por %p524_p13, %p523_p12 }
  0x1f   :  { %p526_p1 = pnand %p525_p0, %p519_p11 }
  0x21   :  { %529 = shalt.err (!%p526_p1)
}
  0x22   :  { %24 = dma.hbm_to_vmem [thread:$0]  %s689_s0, 256, %s616_s21, [#allocation3], %s582_s30, %s582_s30, %s583_s6  }
  0x23   :  { %s584_s18 = smov [#allocation7]   ;;  %s530_s23 = scalar_lea.hbm %s692_s3, 2048 }
  0x24   :  { %s44_s19 = sshll.u32 %s584_s18, 4  ;;  %p531_p2 = scmp.ne.s32.totalorder %s692_s3, %s530_s23  ;;  %s45_s19 = int_to_ptr.vmem [resolvable:$true] %s44_s19 }
  0x25   :  { %p534_p3 = scmp.lt.u32.totalorder %s530_s23, %s692_s3 }
  0x27   :  { %p536_p4 = pnand %p534_p3, %p531_p2 }
  0x29   :  { %539 = shalt.err (!%p536_p4)
}
  0x2a   :  { %s540_s28 = scalar_lea.vmem %s45_s19, 2048  ;;  %p545_p6 = scmp.lt.s32.totalorder %s45_s19, %s45_s19 }
  0x2b   :  { %p541_p5 = scmp.ne.s32.totalorder %s45_s19, %s540_s28  ;;  %p546_p7 = scmp.lt.s32.totalorder %s540_s28, %s540_s28 }
  0x2d   :  { %p547_p8 = por %p546_p7, %p545_p6 }
  0x2f   :  { %p548_p9 = pnand %p547_p8, %p541_p5 }
  0x31   :  { %551 = shalt.err (!%p548_p9)
}
  0x32   :  { %50 = dma.hbm_to_vmem [thread:$0]  %s692_s3, 2048, %s45_s19, [#allocation6], %s582_s30, %s582_s30, %s583_s6  }
  0x33   :  { %574 = dma.done.wait [#allocation3], 256  }
  0x34   :  { %575 = vsyncadd [#allocation3], 4294967040 }
  0x35   :  { %576 = dma.done.wait [#allocation6], 4096  }
  0x36   :  { %577 = vsyncadd [#allocation6], 4294963200  ;;  %v64_v0 = vld [vmem:[#allocation5] sm:$0xff]  ;;  %v65_v1 = vld [vmem:[#allocation5 + $0x8] sm:$0xff]  ;;  %s585_s8 = smov [#allocation8]  }
  0x37   :  { %v66_v2 = vld [vmem:[#allocation5 + $0x10] sm:$0xff]  ;;  %v408_v3 = vpack.c.bf16 %v65_v1, %v64_v0  ;;  %v67_v4 = vld [vmem:[#allocation5 + $0x18] sm:$0xff]  ;;  %v68_v6 = vld [vmem:[#allocation5 + $0x20] sm:$0xff]  ;;  %s287_s9 = sshll.u32 %s585_s8, 4  ;;  %s288_s9 = int_to_ptr.vmem [resolvable:$true] %s287_s9 }
  0x38   :  { %v412_v5 = vpack.c.bf16 %v67_v4, %v66_v2  ;;  %v69_v7 = vld [vmem:[#allocation5 + $0x28] sm:$0xff]  ;;  %v70_v9 = vld [vmem:[#allocation5 + $0x30] sm:$0xff]  ;;  %v71_v10 = vld [vmem:[#allocation5 + $0x38] sm:$0xff]  ;;  %p557_p11 = scmp.lt.s32.totalorder %s288_s9, %s288_s9 }
  0x39   :  { %409 = vmatprep.subr.bf16.mxu0 %v408_v3  ;;  %v416_v8 = vpack.c.bf16 %v69_v7, %v68_v6  ;;  %v62_v11 = vld [vmem:[#allocation2] sm:$0xff]  ;;  %v172_v12 = vld [vmem:[#allocation7] sm:$0xff]  ;;  %v173_v13 = vld [vmem:[#allocation7 + $0x8] sm:$0xff]  ;;  %v420_v20 = vpack.c.bf16 %v71_v10, %v70_v9 }
  0x3a   :  { %411 = vmatpush3.bf16.msra.mxu0 %v408_v3  ;;  %370 = vmatprep.mubr.f32.mxu0 %v62_v11  ;;  %v174_v14 = vld [vmem:[#allocation7 + $0x10] sm:$0xff]  ;;  %v440_v15 = vpack.c.bf16 %v173_v13, %v172_v12  ;;  %v175_v16 = vld [vmem:[#allocation7 + $0x18] sm:$0xff]  ;;  %v176_v18 = vld [vmem:[#allocation7 + $0x20] sm:$0xff] }
  0x3b   :  { %413 = vmatprep.subr.bf16.mxu0 %v412_v5  ;;  %v444_v17 = vpack.c.bf16 %v175_v16, %v174_v14  ;;  %v177_v19 = vld [vmem:[#allocation7 + $0x28] sm:$0xff]  ;;  %v72_v21 = vld [vmem:[#allocation5 + $0x40] sm:$0xff]  ;;  %v74_v25 = vld [vmem:[#allocation5 + $0x50] sm:$0xff] }
  0x3c   :  { %441 = vmatprep.subr.bf16.mxu1 %v440_v15  ;;  %v73_v22 = vld [vmem:[#allocation5 + $0x48] sm:$0xff]  ;;  %v448_v23 = vpack.c.bf16 %v177_v19, %v176_v18  ;;  %v75_v26 = vld [vmem:[#allocation5 + $0x58] sm:$0xff]  ;;  %v76_v28 = vld [vmem:[#allocation5 + $0x60] sm:$0xff] }
  0x3d   :  { %443 = vmatpush3.bf16.msra.mxu1 %v440_v15  ;;  %v424_v24 = vpack.c.bf16 %v73_v22, %v72_v21  ;;  %v428_v27 = vpack.c.bf16 %v75_v26, %v74_v25  ;;  %v77_v29 = vld [vmem:[#allocation5 + $0x68] sm:$0xff]  ;;  %v78_v31 = vld [vmem:[#allocation5 + $0x70] sm:$0xff]  ;;  %v79_v32 = vld [vmem:[#allocation5 + $0x78] sm:$0xff] }
  0x3e   :  { %415 = vmatpush3.bf16.msra.mxu0 %v412_v5  ;;  %445 = vmatprep.subr.bf16.mxu1 %v444_v17  ;;  %v432_v30 = vpack.c.bf16 %v77_v29, %v76_v28  ;;  %v436_v33 = vpack.c.bf16 %v79_v32, %v78_v31  ;;  %v63_v34 = vld [vmem:[#allocation2 + $0x8] sm:$0xff]  ;;  %v178_v35 = vld [vmem:[#allocation7 + $0x30] sm:$0xff]  ;;  %v180_v38 = vld [vmem:[#allocation7 + $0x40] sm:$0xff] }
  0x3f   :  { %417 = vmatprep.subr.bf16.mxu0 %v416_v8  ;;  %v179_v36 = vld [vmem:[#allocation7 + $0x38] sm:$0xff]  ;;  %v181_v39 = vld [vmem:[#allocation7 + $0x48] sm:$0xff]  ;;  %v182_v41 = vld [vmem:[#allocation7 + $0x50] sm:$0xff] }
  0x40   :  { %v452_v37 = vpack.c.bf16 %v179_v36, %v178_v35  ;;  %v456_v40 = vpack.c.bf16 %v181_v39, %v180_v38  ;;  %v183_v42 = vld [vmem:[#allocation7 + $0x58] sm:$0xff]  ;;  %v184_v44 = vld [vmem:[#allocation7 + $0x60] sm:$0xff]  ;;  %v185_v45 = vld [vmem:[#allocation7 + $0x68] sm:$0xff] }
  0x41   :  { %447 = vmatpush3.bf16.msra.mxu1 %v444_v17  ;;  %v460_v43 = vpack.c.bf16 %v183_v42, %v182_v41  ;;  %v464_v46 = vpack.c.bf16 %v185_v45, %v184_v44  ;;  %v186_v47 = vld [vmem:[#allocation7 + $0x70] sm:$0xff]  ;;  %v187_v48 = vld [vmem:[#allocation7 + $0x78] sm:$0xff] }
  0x42   :  { %419 = vmatpush3.bf16.msra.mxu0 %v416_v8  ;;  %449 = vmatprep.subr.bf16.mxu1 %v448_v23  ;;  %v468_v49 = vpack.c.bf16 %v187_v48, %v186_v47  ;;  %v300_v50 = vld [vmem:[%s691_s2] ss:$0 sm:$0xff] }
  0x43   :  { %421 = vmatprep.subr.bf16.mxu0 %v420_v20  ;;  %v301_v1 = vld [vmem:[%s693_s4] ss:$0 sm:$0xff]  ;;  %s552_s4 = scalar_lea.vmem %s288_s9, 256 }
  0x44   :  { %p553_p10 = scmp.ne.s32.totalorder %s288_s9, %s552_s4  ;;  %p558_p12 = scmp.lt.s32.totalorder %s552_s4, %s552_s4 }
  0x45   :  { %451 = vmatpush3.bf16.msra.mxu1 %v448_v23 }
  0x46   :  { %423 = vmatpush3.bf16.msra.mxu0 %v420_v20  ;;  %453 = vmatprep.subr.bf16.mxu1 %v452_v37  ;;  %p559_p13 = por %p558_p12, %p557_p11 }
  0x47   :  { %425 = vmatprep.subr.bf16.mxu0 %v424_v24 }
  0x48   :  { %p560_p0 = pnand %p559_p13, %p553_p10 }
  0x49   :  { %455 = vmatpush3.bf16.msra.mxu1 %v452_v37 }
  0x4a   :  { %427 = vmatpush3.bf16.msra.mxu0 %v424_v24  ;;  %457 = vmatprep.subr.bf16.mxu1 %v456_v40 }
  0x4b   :  { %429 = vmatprep.subr.bf16.mxu0 %v428_v27 }
  0x4d   :  { %459 = vmatpush3.bf16.msra.mxu1 %v456_v40 }
  0x4e   :  { %431 = vmatpush3.bf16.msra.mxu0 %v428_v27  ;;  %461 = vmatprep.subr.bf16.mxu1 %v460_v43 }
  0x4f   :  { %433 = vmatprep.subr.bf16.mxu0 %v432_v30 }
  0x51   :  { %463 = vmatpush3.bf16.msra.mxu1 %v460_v43 }
  0x52   :  { %435 = vmatpush3.bf16.msra.mxu0 %v432_v30  ;;  %465 = vmatprep.subr.bf16.mxu1 %v464_v46 }
  0x53   :  { %437 = vmatprep.subr.bf16.mxu0 %v436_v33 }
  0x55   :  { %467 = vmatpush3.bf16.msra.mxu1 %v464_v46 }
  0x56   :  { %439 = vmatpush3.bf16.msra.mxu0 %v436_v33  ;;  %469 = vmatprep.subr.bf16.mxu1 %v468_v49 }
  0x59   :  { %371 = vmatmul.mubr.f32.vlgmr.msra.gmra.mrb[0].mxu0 %v63_v34  ;;  %471 = vmatpush3.bf16.msra.mxu1 %v468_v49 }
 0x12c   :  { %v372_v51 = vpop.f32.mrb[0].mxu0 }
 0x12d   :  { %v159_v52 = vadd.f32 %v372_v51, %v300_v50  ;;  %v153_v53 = vpop.f32.mrb[1].mxu0 }
 0x12e   :  { %v154_v54 = vadd.f32 %v300_v50, %v153_v53 }
 0x12f   :  { %v165_v55 = vmul.f32 0.70710677, %v159_v52  ;;  %v163_v62 = vmul.f32 0.5, %v159_v52 }
 0x130   :  { %v164_v56 = vmul.f32 0.70710677, %v154_v54  ;;  %v162_v60 = vmul.f32 0.5, %v154_v54 }
 0x131   :  { %478 = verf.f32 %v165_v55 }
 0x132   :  { %480 = verf.f32 %v164_v56 }
 0x13b   :  { %v479_v57 = vpop.eup %478 }
 0x13c   :  { %v481_v58 = vpop.eup %480  ;;  %v169_v59 = vadd.f32 1.0, %v479_v57 }
 0x13d   :  { %v168_v61 = vadd.f32 1.0, %v481_v58 }
 0x13e   :  { %v171_v0 = vmul.f32 %v169_v59, %v163_v62 }
 0x13f   :  { %v170_v63 = vmul.f32 %v168_v61, %v162_v60 }
 0x141   :  { %405 = vmatprep.mubr.f32.mxu1 %v170_v63 }
 0x142   :  { %406 = vmatmul.mubr.f32.vlgmr.msra.gmra.mrb[0].mxu1 %v171_v0 }
 0x215   :  { %v407_v2 = vpop.f32.mrb[0].mxu1 }
 0x216   :  { %v267_v3 = vadd.f32 %v407_v2, %v301_v1  ;;  %v261_v4 = vpop.f32.mrb[1].mxu1 }
 0x217   :  { %v262_v5 = vadd.f32 %v301_v1, %v261_v4 }
 0x218   :  { %v273_v6 = vmul.f32 0.70710677, %v267_v3  ;;  %v271_v10 = vmul.f32 0.5, %v267_v3 }
 0x219   :  { %v272_v7 = vmul.f32 0.70710677, %v262_v5  ;;  %v270_v12 = vmul.f32 0.5, %v262_v5 }
 0x21a   :  { %482 = verf.f32 %v273_v6 }
 0x21b   :  { %484 = verf.f32 %v272_v7 }
 0x224   :  { %v483_v8 = vpop.eup %482 }
 0x225   :  { %v485_v9 = vpop.eup %484  ;;  %v277_v11 = vadd.f32 1.0, %v483_v8 }
 0x226   :  { %v276_v13 = vadd.f32 1.0, %v485_v9 }
 0x227   :  { %v279_v14 = vmul.f32 %v277_v11, %v271_v10 }
 0x228   :  { %v278_v15 = vmul.f32 %v276_v13, %v270_v12 }
 0x229   :  { %281 = vst [vmem:[#allocation8 + $0x8] sm:$0xff] %v279_v14 }
 0x22a   :  { %280 = vst [vmem:[#allocation8] sm:$0xff] %v278_v15 }
 0x22b   :  { %563 = shalt.err (!%p560_p0)
}
 0x22c   :  { %s564_s12 = scalar_lea.hbm %s694_s5, 256 }
 0x22d   :  { %p565_p1 = scmp.ne.s32.totalorder %s694_s5, %s564_s12  ;;  %p568_p2 = scmp.lt.u32.totalorder %s564_s12, %s694_s5 }
 0x22f   :  { %p570_p3 = pnand %p568_p2, %p565_p1 }
 0x231   :  { %573 = shalt.err (!%p570_p3)
}
 0x232   :  { %293 = dma.vmem_to_hbm [thread:$0]  %s288_s9, 256, %s694_s5, [#allocation4], %s582_s30, %s582_s30, %s583_s6  }
 0x233   :  { %578 = dma.done.wait [#allocation4], 256  }
 0x234   :  { %579 = vsyncadd [#allocation4], 4294967040 }
 0x235   :  { %297 = vsyncpa [#allocation3], 1 }
 0x236   :  { %298 = vsyncpa [#allocation6], 1 }
 0x237   :  { %299 = vsyncpa [#allocation4], 1 }

// kernel: tpu_custom_call.1
= control target key start
LH: loop header
LB: loop body
LE: loop exit
PB: predicated region body
PF: predicated region fallthrough
CT: control target
= control target key end

     0   :  { %10 = vsyncpa [#allocation3], 0  ;;  %s689_s0 = inlined_call_operand.hbm [shape: f32[16,128], index: 0, kind: input, shape index: {}]   ;;  %s690_s1 = inlined_call_operand.hbm [shape: f32[128,128], index: 1, kind: input, shape index: {}]   ;;  %s691_s2 = inlined_call_operand.vmem [shape: f32[1,128], index: 2, kind: input, shape index: {}]   ;;  %s692_s3 = inlined_call_operand.hbm [shape: f32[128,128], index: 3, kind: input, shape index: {}]   ;;  %s693_s4 = inlined_call_operand.vmem [shape: f32[1,128], index: 4, kind: input, shape index: {}]   ;;  %s694_s5 = inlined_call_operand.hbm [shape: f32[16,128], index: 5, kind: output, shape index: {}]  }
   0x1   :  { %11 = vsyncpa [#allocation6], 0 }
   0x2   :  { %12 = vsyncpa [#allocation4], 0  ;;  %s580_s18 = smov [#allocation5]   ;;  %s581_s20 = smov [#allocation2]  }
   0x3   :  { %s30_s19 = sshll.u32 %s580_s18, 4  ;;  %s18_s21 = sshll.u32 %s581_s20, 4  ;;  %s31_s19 = int_to_ptr.vmem [resolvable:$true] %s30_s19  ;;  %s616_s21 = int_to_ptr.vmem [resolvable:$true] %s18_s21 }
   0x4   :  { %s486_s24 = scalar_lea.hbm %s690_s1, 2048 }
   0x5   :  { %p487_p0 = scmp.ne.s32.totalorder %s690_s1, %s486_s24  ;;  %p490_p1 = scmp.lt.u32.totalorder %s486_s24, %s690_s1 }
   0x7   :  { %p492_p2 = pnand %p490_p1, %p487_p0 }
   0x9   :  { %495 = shalt.err (!%p492_p2)
}
   0xa   :  { %s496_s29 = scalar_lea.vmem %s31_s19, 2048  ;;  %p501_p4 = scmp.lt.s32.totalorder %s31_s19, %s31_s19 }
   0xb   :  { %p497_p3 = scmp.ne.s32.totalorder %s31_s19, %s496_s29  ;;  %p502_p5 = scmp.lt.s32.totalorder %s496_s29, %s496_s29 }
   0xd   :  { %p503_p6 = por %p502_p5, %p501_p4 }
   0xf   :  { %p504_p7 = pnand %p503_p6, %p497_p3 }
  0x11   :  { %507 = shalt.err (!%p504_p7)
}
  0x12   :  { %s582_s30 = smov 128   ;;  %s583_s6 = smov 8  }
  0x13   :  { %36 = dma.hbm_to_vmem [thread:$0]  %s690_s1, 2048, %s31_s19, [#allocation6], %s582_s30, %s582_s30, %s583_s6  }
  0x14   :  { %s508_s11 = scalar_lea.hbm %s689_s0, 256 }
  0x15   :  { %p509_p8 = scmp.ne.s32.totalorder %s689_s0, %s508_s11  ;;  %p512_p9 = scmp.lt.u32.totalorder %s508_s11, %s689_s0 }
  0x17   :  { %p514_p10 = pnand %p512_p9, %p509_p8 }
  0x19   :  { %517 = shalt.err (!%p514_p10)
}
  0x1a   :  { %s518_s16 = scalar_lea.vmem %s616_s21, 256  ;;  %p523_p12 = scmp.lt.s32.totalorder %s616_s21, %s616_s21 }
  0x1b   :  { %p519_p11 = scmp.ne.s32.totalorder %s616_s21, %s518_s16  ;;  %p524_p13 = scmp.lt.s32.totalorder %s518_s16, %s518_s16 }
  0x1d   :  { %p525_p0 = por %p524_p13, %p523_p12 }
  0x1f   :  { %p526_p1 = pnand %p525_p0, %p519_p11 }
  0x21   :  { %529 = shalt.err (!%p526_p1)
}
  0x22   :  { %24 = dma.hbm_to_vmem [thread:$0]  %s689_s0, 256, %s616_s21, [#allocation3], %s582_s30, %s582_s30, %s583_s6  }
  0x23   :  { %s584_s18 = smov [#allocation7]   ;;  %s530_s23 = scalar_lea.hbm %s692_s3, 2048 }
  0x24   :  { %s44_s19 = sshll.u32 %s584_s18, 4  ;;  %p531_p2 = scmp.ne.s32.totalorder %s692_s3, %s530_s23  ;;  %s45_s19 = int_to_ptr.vmem [resolvable:$true] %s44_s19 }
  0x25   :  { %p534_p3 = scmp.lt.u32.totalorder %s530_s23, %s692_s3 }
  0x27   :  { %p536_p4 = pnand %p534_p3, %p531_p2 }
  0x29   :  { %539 = shalt.err (!%p536_p4)
}
  0x2a   :  { %s540_s28 = scalar_lea.vmem %s45_s19, 2048  ;;  %p545_p6 = scmp.lt.s32.totalorder %s45_s19, %s45_s19 }
  0x2b   :  { %p541_p5 = scmp.ne.s32.totalorder %s45_s19, %s540_s28  ;;  %p546_p7 = scmp.lt.s32.totalorder %s540_s28, %s540_s28 }
  0x2d   :  { %p547_p8 = por %p546_p7, %p545_p6 }
  0x2f   :  { %p548_p9 = pnand %p547_p8, %p541_p5 }
  0x31   :  { %551 = shalt.err (!%p548_p9)
}
  0x32   :  { %50 = dma.hbm_to_vmem [thread:$0]  %s692_s3, 2048, %s45_s19, [#allocation6], %s582_s30, %s582_s30, %s583_s6  }
  0x33   :  { %574 = dma.done.wait [#allocation3], 256  }
  0x34   :  { %575 = vsyncadd [#allocation3], 4294967040 }
  0x35   :  { %576 = dma.done.wait [#allocation6], 4096  }
  0x36   :  { %577 = vsyncadd [#allocation6], 4294963200  ;;  %v64_v0 = vld [vmem:[#allocation5] sm:$0xff]  ;;  %v65_v1 = vld [vmem:[#allocation5 + $0x8] sm:$0xff]  ;;  %s585_s8 = smov [#allocation8]  }
  0x37   :  { %v66_v2 = vld [vmem:[#allocation5 + $0x10] sm:$0xff]  ;;  %v408_v3 = vpack.c.bf16 %v65_v1, %v64_v0  ;;  %v67_v4 = vld [vmem:[#allocation5 + $0x18] sm:$0xff]  ;;  %v68_v6 = vld [vmem:[#allocation5 + $0x20] sm:$0xff]  ;;  %s287_s9 = sshll.u32 %s585_s8, 4  ;;  %s288_s9 = int_to_ptr.vmem [resolvable:$true] %s287_s9 }
  0x38   :  { %v412_v5 = vpack.c.bf16 %v67_v4, %v66_v2  ;;  %v69_v7 = vld [vmem:[#allocation5 + $0x28] sm:$0xff]  ;;  %v70_v9 = vld [vmem:[#allocation5 + $0x30] sm:$0xff]  ;;  %v71_v10 = vld [vmem:[#allocation5 + $0x38] sm:$0xff]  ;;  %p557_p11 = scmp.lt.s32.totalorder %s288_s9, %s288_s9 }
  0x39   :  { %409 = vmatprep.subr.bf16.mxu0 %v408_v3  ;;  %v416_v8 = vpack.c.bf16 %v69_v7, %v68_v6  ;;  %v62_v11 = vld [vmem:[#allocation2] sm:$0xff]  ;;  %v172_v12 = vld [vmem:[#allocation7] sm:$0xff]  ;;  %v173_v13 = vld [vmem:[#allocation7 + $0x8] sm:$0xff]  ;;  %v420_v20 = vpack.c.bf16 %v71_v10, %v70_v9 }
  0x3a   :  { %411 = vmatpush3.bf16.msra.mxu0 %v408_v3  ;;  %370 = vmatprep.mubr.f32.mxu0 %v62_v11  ;;  %v174_v14 = vld [vmem:[#allocation7 + $0x10] sm:$0xff]  ;;  %v440_v15 = vpack.c.bf16 %v173_v13, %v172_v12  ;;  %v175_v16 = vld [vmem:[#allocation7 + $0x18] sm:$0xff]  ;;  %v176_v18 = vld [vmem:[#allocation7 + $0x20] sm:$0xff] }
  0x3b   :  { %413 = vmatprep.subr.bf16.mxu0 %v412_v5  ;;  %v444_v17 = vpack.c.bf16 %v175_v16, %v174_v14  ;;  %v177_v19 = vld [vmem:[#allocation7 + $0x28] sm:$0xff]  ;;  %v72_v21 = vld [vmem:[#allocation5 + $0x40] sm:$0xff]  ;;  %v74_v25 = vld [vmem:[#allocation5 + $0x50] sm:$0xff] }
  0x3c   :  { %441 = vmatprep.subr.bf16.mxu1 %v440_v15  ;;  %v73_v22 = vld [vmem:[#allocation5 + $0x48] sm:$0xff]  ;;  %v448_v23 = vpack.c.bf16 %v177_v19, %v176_v18  ;;  %v75_v26 = vld [vmem:[#allocation5 + $0x58] sm:$0xff]  ;;  %v76_v28 = vld [vmem:[#allocation5 + $0x60] sm:$0xff] }
  0x3d   :  { %443 = vmatpush3.bf16.msra.mxu1 %v440_v15  ;;  %v424_v24 = vpack.c.bf16 %v73_v22, %v72_v21  ;;  %v428_v27 = vpack.c.bf16 %v75_v26, %v74_v25  ;;  %v77_v29 = vld [vmem:[#allocation5 + $0x68] sm:$0xff]  ;;  %v78_v31 = vld [vmem:[#allocation5 + $0x70] sm:$0xff]  ;;  %v79_v32 = vld [vmem:[#allocation5 + $0x78] sm:$0xff] }
  0x3e   :  { %415 = vmatpush3.bf16.msra.mxu0 %v412_v5  ;;  %445 = vmatprep.subr.bf16.mxu1 %v444_v17  ;;  %v432_v30 = vpack.c.bf16 %v77_v29, %v76_v28  ;;  %v436_v33 = vpack.c.bf16 %v79_v32, %v78_v31  ;;  %v63_v34 = vld [vmem:[#allocation2 + $0x8] sm:$0xff]  ;;  %v178_v35 = vld [vmem:[#allocation7 + $0x30] sm:$0xff]  ;;  %v180_v38 = vld [vmem:[#allocation7 + $0x40] sm:$0xff] }
  0x3f   :  { %417 = vmatprep.subr.bf16.mxu0 %v416_v8  ;;  %v179_v36 = vld [vmem:[#allocation7 + $0x38] sm:$0xff]  ;;  %v181_v39 = vld [vmem:[#allocation7 + $0x48] sm:$0xff]  ;;  %v182_v41 = vld [vmem:[#allocation7 + $0x50] sm:$0xff] }
  0x40   :  { %v452_v37 = vpack.c.bf16 %v179_v36, %v178_v35  ;;  %v456_v40 = vpack.c.bf16 %v181_v39, %v180_v38  ;;  %v183_v42 = vld [vmem:[#allocation7 + $0x58] sm:$0xff]  ;;  %v184_v44 = vld [vmem:[#allocation7 + $0x60] sm:$0xff]  ;;  %v185_v45 = vld [vmem:[#allocation7 + $0x68] sm:$0xff] }
  0x41   :  { %447 = vmatpush3.bf16.msra.mxu1 %v444_v17  ;;  %v460_v43 = vpack.c.bf16 %v183_v42, %v182_v41  ;;  %v464_v46 = vpack.c.bf16 %v185_v45, %v184_v44  ;;  %v186_v47 = vld [vmem:[#allocation7 + $0x70] sm:$0xff]  ;;  %v187_v48 = vld [vmem:[#allocation7 + $0x78] sm:$0xff] }
  0x42   :  { %419 = vmatpush3.bf16.msra.mxu0 %v416_v8  ;;  %449 = vmatprep.subr.bf16.mxu1 %v448_v23  ;;  %v468_v49 = vpack.c.bf16 %v187_v48, %v186_v47  ;;  %v300_v50 = vld [vmem:[%s691_s2] ss:$0 sm:$0xff] }
  0x43   :  { %421 = vmatprep.subr.bf16.mxu0 %v420_v20  ;;  %v301_v1 = vld [vmem:[%s693_s4] ss:$0 sm:$0xff]  ;;  %s552_s4 = scalar_lea.vmem %s288_s9, 256 }
  0x44   :  { %p553_p10 = scmp.ne.s32.totalorder %s288_s9, %s552_s4  ;;  %p558_p12 = scmp.lt.s32.totalorder %s552_s4, %s552_s4 }
  0x45   :  { %451 = vmatpush3.bf16.msra.mxu1 %v448_v23 }
  0x46   :  { %423 = vmatpush3.bf16.msra.mxu0 %v420_v20  ;;  %453 = vmatprep.subr.bf16.mxu1 %v452_v37  ;;  %p559_p13 = por %p558_p12, %p557_p11 }
  0x47   :  { %425 = vmatprep.subr.bf16.mxu0 %v424_v24 }
  0x48   :  { %p560_p0 = pnand %p559_p13, %p553_p10 }
  0x49   :  { %455 = vmatpush3.bf16.msra.mxu1 %v452_v37 }
  0x4a   :  { %427 = vmatpush3.bf16.msra.mxu0 %v424_v24  ;;  %457 = vmatprep.subr.bf16.mxu1 %v456_v40 }
  0x4b   :  { %429 = vmatprep.subr.bf16.mxu0 %v428_v27 }
  0x4d   :  { %459 = vmatpush3.bf16.msra.mxu1 %v456_v40 }
  0x4e   :  { %431 = vmatpush3.bf16.msra.mxu0 %v428_v27  ;;  %461 = vmatprep.subr.bf16.mxu1 %v460_v43 }
  0x4f   :  { %433 = vmatprep.subr.bf16.mxu0 %v432_v30 }
  0x51   :  { %463 = vmatpush3.bf16.msra.mxu1 %v460_v43 }
  0x52   :  { %435 = vmatpush3.bf16.msra.mxu0 %v432_v30  ;;  %465 = vmatprep.subr.bf16.mxu1 %v464_v46 }
  0x53   :  { %437 = vmatprep.subr.bf16.mxu0 %v436_v33 }
  0x55   :  { %467 = vmatpush3.bf16.msra.mxu1 %v464_v46 }
  0x56   :  { %439 = vmatpush3.bf16.msra.mxu0 %v436_v33  ;;  %469 = vmatprep.subr.bf16.mxu1 %v468_v49 }
  0x59   :  { %371 = vmatmul.mubr.f32.vlgmr.msra.gmra.mrb[0].mxu0 %v63_v34  ;;  %471 = vmatpush3.bf16.msra.mxu1 %v468_v49 }
 0x12c   :  { %v372_v51 = vpop.f32.mrb[0].mxu0 }
 0x12d   :  { %v159_v52 = vadd.f32 %v372_v51, %v300_v50  ;;  %v153_v53 = vpop.f32.mrb[1].mxu0 }
 0x12e   :  { %v154_v54 = vadd.f32 %v300_v50, %v153_v53 }
 0x12f   :  { %v165_v55 = vmul.f32 0.70710677, %v159_v52  ;;  %v163_v62 = vmul.f32 0.5, %v159_v52 }
 0x130   :  { %v164_v56 = vmul.f32 0.70710677, %v154_v54  ;;  %v162_v60 = vmul.f32 0.5, %v154_v54 }
 0x131   :  { %478 = verf.f32 %v165_v55 }
 0x132   :  { %480 = verf.f32 %v164_v56 }
 0x13b   :  { %v479_v57 = vpop.eup %478 }
 0x13c   :  { %v481_v58 = vpop.eup %480  ;;  %v169_v59 = vadd.f32 1.0, %v479_v57 }
 0x13d   :  { %v168_v61 = vadd.f32 1.0, %v481_v58 }
 0x13e   :  { %v171_v0 = vmul.f32 %v169_v59, %v163_v62 }
 0x13f   :  { %v170_v63 = vmul.f32 %v168_v61, %v162_v60 }
 0x141   :  { %405 = vmatprep.mubr.f32.mxu1 %v170_v63 }
 0x142   :  { %406 = vmatmul.mubr.f32.vlgmr.msra.gmra.mrb[0].mxu1 %v171_v0 }
 0x215   :  { %v407_v2 = vpop.f32.mrb[0].mxu1 }
 0x216   :  { %v267_v3 = vadd.f32 %v407_v2, %v301_v1  ;;  %v261_v4 = vpop.f32.mrb[1].mxu1 }
 0x217   :  { %v262_v5 = vadd.f32 %v301_v1, %v261_v4 }
 0x218   :  { %v273_v6 = vmul.f32 0.70710677, %v267_v3  ;;  %v271_v10 = vmul.f32 0.5, %v267_v3 }
 0x219   :  { %v272_v7 = vmul.f32 0.70710677, %v262_v5  ;;  %v270_v12 = vmul.f32 0.5, %v262_v5 }
 0x21a   :  { %482 = verf.f32 %v273_v6 }
 0x21b   :  { %484 = verf.f32 %v272_v7 }
 0x224   :  { %v483_v8 = vpop.eup %482 }
 0x225   :  { %v485_v9 = vpop.eup %484  ;;  %v277_v11 = vadd.f32 1.0, %v483_v8 }
 0x226   :  { %v276_v13 = vadd.f32 1.0, %v485_v9 }
 0x227   :  { %v279_v14 = vmul.f32 %v277_v11, %v271_v10 }
 0x228   :  { %v278_v15 = vmul.f32 %v276_v13, %v270_v12 }
 0x229   :  { %281 = vst [vmem:[#allocation8 + $0x8] sm:$0xff] %v279_v14 }
 0x22a   :  { %280 = vst [vmem:[#allocation8] sm:$0xff] %v278_v15 }
 0x22b   :  { %563 = shalt.err (!%p560_p0)
}
 0x22c   :  { %s564_s12 = scalar_lea.hbm %s694_s5, 256 }
 0x22d   :  { %p565_p1 = scmp.ne.s32.totalorder %s694_s5, %s564_s12  ;;  %p568_p2 = scmp.lt.u32.totalorder %s564_s12, %s694_s5 }
 0x22f   :  { %p570_p3 = pnand %p568_p2, %p565_p1 }
 0x231   :  { %573 = shalt.err (!%p570_p3)
}
 0x232   :  { %293 = dma.vmem_to_hbm [thread:$0]  %s288_s9, 256, %s694_s5, [#allocation4], %s582_s30, %s582_s30, %s583_s6  }
 0x233   :  { %578 = dma.done.wait [#allocation4], 256  }
 0x234   :  { %579 = vsyncadd [#allocation4], 4294967040 }
 0x235   :  { %297 = vsyncpa [#allocation3], 1 }
 0x236   :  { %298 = vsyncpa [#allocation6], 1 }
 0x237   :  { %299 = vsyncpa [#allocation4], 1 }

</bundles_post_ra>
